<compile_context>
chip_gen: v5e
topology: v5e:2x2
jax: 0.10.0
libtpu: 0.0.40
codegen_flags: <defaults>
</compile_context>

<pallas_src>
import functools

import jax
import jax.numpy as jnp
from jax import lax
from jax.experimental import pallas as pl
from jax.experimental.pallas import tpu as pltpu

_LANE = 128
_SUB = 8
_NSPLIT = 2                      # leading "parallel" grid axis (2 TCs on v7x)
_TILE_BYTES = 4 * 1024 * 1024    # ~4 MiB per input per buffer
_VMEM_LIMIT = 32 * 1024 * 1024   # safe on v5e/v6e/v7x; holds 16 MiB of buffers


def _weight(t, gamma):
    """target ** gamma.  Small integer gammas stay on the VALU (square-and-
    multiply); everything else falls through to the general pow path."""
    g_int = None
    if isinstance(gamma, bool):
        g_int = int(gamma)
    elif isinstance(gamma, int):
        g_int = gamma
    elif isinstance(gamma, float) and float(gamma).is_integer():
        g_int = int(gamma)

    if g_int is not None and abs(g_int) <= 8:
        if g_int == 0:
            return jnp.ones_like(t)
        e = abs(g_int)
        base = t
        result = None
        while e:
            if e & 1:
                result = base if result is None else result * base
            e >>= 1
            if e:
                base = base * base
        return (1.0 / result) if g_int < 0 else result

    # General path: lowers to exp(gamma*log(t)) on the EUP (NaN for negative t
    # with non-integer gamma -- same as torch.pow).
    return t ** gamma


def _weighted_mse_kernel(x_ref, t_ref, o_ref, *, gamma, block_rows,
                         last_valid_rows, mask_last_block):
    i = pl.program_id(1)          # reduction step within this split

    @pl.when(i == 0)
    def _():
        o_ref[...] = jnp.zeros_like(o_ref)

    x = x_ref[0].astype(jnp.float32)       # (block_rows, 128)
    t = t_ref[0].astype(jnp.float32)

    w = _weight(t, gamma)
    d = (x - t) * w                        # == x*w - t*w
    sq = d * d

    def fold(v):
        # Sublane fold into the resident (8,128) accumulator: pure VALU adds.
        return jnp.sum(v.reshape(block_rows // _SUB, _SUB, _LANE), axis=0)

    if mask_last_block:
        last = pl.num_programs(1) - 1

        @pl.when(i != last)
        def _():
            o_ref[...] += fold(sq)

        @pl.when(i == last)
        def _():
            # The aligned prefix is a multiple of 128 elements, so only whole
            # rows of the final (partial) block can be invalid: a row-index
            # compare is enough (no lane iota, no extra int32 temp).
            row = lax.broadcasted_iota(jnp.int32, (block_rows, _LANE), 0)
            o_ref[...] += fold(jnp.where(row < last_valid_rows, sq, 0.0))
    else:
        o_ref[...] += fold(sq)


def weighted_loss(input_img, target, gamma=1, *, tile_bytes=_TILE_BYTES,
                  num_splits=_NSPLIT):
    """Pallas-backed equivalent of WeightedLoss(MSELoss(), gamma).forward."""
    assert input_img.shape == target.shape
    assert isinstance(gamma, (int, float)), "gamma must be a static Python scalar"

    n = input_img.size
    x = input_img.reshape(-1)              # native dtype; cast in-kernel
    t = target.reshape(-1)

    dtype_bytes = jnp.dtype(input_img.dtype).itemsize
    # Minimum sublane tile: 8 rows for 32-bit, 16 for 16-bit, 32 for 8-bit.
    sub_unit = _SUB * max(1, 4 // dtype_bytes)
    unit = num_splits * sub_unit * _LANE

    n_main = n - (n % unit)                # largest aligned prefix
    total = jnp.zeros((), jnp.float32)

    if n_main:
        rows = n_main // _LANE
        rows_per_split = rows // num_splits
        x3 = x[:n_main].reshape(num_splits, rows_per_split, _LANE)
        t3 = t[:n_main].reshape(num_splits, rows_per_split, _LANE)

        # Tile size by bytes (not rows): ~tile_bytes per input per buffer.
        br_target = (tile_bytes // (_LANE * dtype_bytes)) // sub_unit * sub_unit
        br_target = max(sub_unit, br_target)
        br = min(br_target, rows_per_split)        # multiple of sub_unit
        inner = pl.cdiv(rows_per_split, br)
        rem = rows_per_split % br
        mask_last_block = rem != 0
        last_valid_rows = rem if rem else br

        kernel = functools.partial(
            _weighted_mse_kernel, gamma=gamma, block_rows=br,
            last_valid_rows=last_valid_rows, mask_last_block=mask_last_block)

        is_small_int_gamma = (
            float(gamma).is_integer() and abs(int(gamma)) <= 8)
        cost = pl.CostEstimate(
            flops=6 * n_main,
            transcendentals=0 if is_small_int_gamma else 2 * n_main,
            bytes_accessed=2 * n_main * dtype_bytes)

        partials = pl.pallas_call(
            kernel,
            out_shape=jax.ShapeDtypeStruct((num_splits * _SUB, _LANE),
                                           jnp.float32),
            grid_spec=pltpu.PrefetchScalarGridSpec(
                num_scalar_prefetch=0,
                grid=(num_splits, inner),
                in_specs=[
                    pl.BlockSpec((1, br, _LANE), lambda c, i: (c, i, 0)),
                    pl.BlockSpec((1, br, _LANE), lambda c, i: (c, i, 0)),
                ],
                out_specs=pl.BlockSpec((_SUB, _LANE), lambda c, i: (c, 0)),
            ),
            compiler_params=pltpu.CompilerParams(
                dimension_semantics=("parallel", "arbitrary"),
                vmem_limit_bytes=_VMEM_LIMIT),
            cost_estimate=cost,
        )(x3, t3)

        # Single tiny cross-lane reduce, outside the hot loop.
        total = jnp.sum(partials)

    # Ragged tail (< unit elements): plain jnp, no whole-array pad copy.
    if n - n_main:
        xt = x[n_main:].astype(jnp.float32)
        tt = t[n_main:].astype(jnp.float32)
        wt = _weight(tt, gamma)
        dt_ = (xt - tt) * wt
        total = total + jnp.sum(dt_ * dt_)

    # NOTE: accumulation is sequential per (split, sublane, lane) slot in f32;
    # for >=1e8-element tensors expect ~1e-5 relative drift vs float64.
    return total / n


if __name__ == "__main__":
    key = jax.random.PRNGKey(0)
    k1, k2, k3, k4, k5, k6 = jax.random.split(key, 6)

    # 1) Small NCHW image shapes, f32, gamma=1 (exactly one aligned unit).
    shape = (2, 4, 16, 16)
    input_img = jax.random.normal(k1, shape, dtype=jnp.float32)
    target = jax.random.normal(k2, shape, dtype=jnp.float32)
    loss = weighted_loss(input_img, target, gamma=1)
    jax.block_until_ready(loss)
    w = target ** 1
    ref = jnp.mean((input_img * w - target * w) ** 2)
    assert jnp.allclose(loss, ref, rtol=1e-5, atol=1e-6), (loss, ref)

    # 2) Ragged size + forced small tiles: exercises the gated partial-block
    #    row mask and the pure-JAX tail path.  gamma=2 (VALU square path).
    n2 = 2 * 24 * 128 + 100
    a = jax.random.normal(k3, (n2,), dtype=jnp.float32)
    b = jax.random.normal(k4, (n2,), dtype=jnp.float32)
    loss2 = weighted_loss(a, b, gamma=2, tile_bytes=16 * _LANE * 4)
    jax.block_until_ready(loss2)
    w2 = b ** 2
    ref2 = jnp.mean((a * w2 - b * w2) ** 2)
    assert jnp.allclose(loss2, ref2, rtol=1e-5, atol=1e-6), (loss2, ref2)

    # 3) bf16 inputs (16-row sublane unit) with gamma=3 (square-and-multiply).
    shape3 = (2, 8, 16, 16)
    c = jax.random.normal(k5, shape3, dtype=jnp.bfloat16)
    d = jax.random.normal(k6, shape3, dtype=jnp.bfloat16)
    loss3 = weighted_loss(c, d, gamma=3)
    jax.block_until_ready(loss3)
    c32, d32 = c.astype(jnp.float32), d.astype(jnp.float32)
    w3 = d32 ** 3
    ref3 = jnp.mean((c32 * w3 - d32 * w3) ** 2)
    assert jnp.allclose(loss3, ref3, rtol=1e-4, atol=1e-6), (loss3, ref3)

    print("KERNEL_OK")
</pallas_src>

<mosaic_0001>
module attributes {stable_mosaic.version = 11 : i64} {
  func.func @_weighted_mse_kernel(%arg0: i32, %arg1: i32, %arg2: memref<1x8x128xf32, #tpu.memory_space<vmem>>, %arg3: memref<1x8x128xf32, #tpu.memory_space<vmem>>, %arg4: memref<8x128xf32, #tpu.memory_space<vmem>>) attributes {dimension_semantics = [#tpu.dimension_semantics<parallel>, #tpu.dimension_semantics<arbitrary>], iteration_bounds = array<i64: 2, 1>, scalar_prefetch = 0 : i64, scratch_operands = 0 : i64, tpu.core_type = #tpu.core_type<tc>, window_params = [{transform_indices = @transform_0, window_bounds = array<i64: 1, 8, 128>}, {transform_indices = @transform_1, window_bounds = array<i64: 1, 8, 128>}, {transform_indices = @transform_2, window_bounds = array<i64: 8, 128>}]} {
    %c0_i32 = arith.constant 0 : i32
    %0 = arith.cmpi eq, %arg1, %c0_i32 : i32
    %1 = arith.extui %0 : i1 to i32
    %c0_i32_0 = arith.constant 0 : i32
    %2 = arith.cmpi ne, %1, %c0_i32_0 : i32
    scf.if %2 {
      %cst_10 = arith.constant 0.000000e+00 : f32
      %15 = vector.broadcast %cst_10 : f32 to vector<8x128xf32>
      %c0_11 = arith.constant 0 : index
      %c0_12 = arith.constant 0 : index
      %16 = vector.load %arg4[%c0_11, %c0_12] : memref<8x128xf32, #tpu.memory_space<vmem>>, vector<8x128xf32>
      tpu.vector_store %arg4[%c0_11, %c0_12], %15 {strides = array<i32>} : memref<8x128xf32, #tpu.memory_space<vmem>>, vector<8x128xf32>,
    } else {
    }
    %c0 = arith.constant 0 : index
    %c0_1 = arith.constant 0 : index
    %c0_2 = arith.constant 0 : index
    %3 = vector.load %arg2[%c0, %c0_1, %c0_2] : memref<1x8x128xf32, #tpu.memory_space<vmem>>, vector<1x8x128xf32>
    %4 = vector.shape_cast %3 : vector<1x8x128xf32> to vector<8x128xf32>
    %c0_3 = arith.constant 0 : index
    %c0_4 = arith.constant 0 : index
    %c0_5 = arith.constant 0 : index
    %5 = vector.load %arg3[%c0_3, %c0_4, %c0_5] : memref<1x8x128xf32, #tpu.memory_space<vmem>>, vector<1x8x128xf32>
    %6 = vector.shape_cast %5 : vector<1x8x128xf32> to vector<8x128xf32>
    %7 = arith.subf %4, %6 : vector<8x128xf32>
    %8 = arith.mulf %7, %6 : vector<8x128xf32>
    %9 = arith.mulf %8, %8 : vector<8x128xf32>
    %c0_6 = arith.constant 0 : index
    %c0_7 = arith.constant 0 : index
    %10 = vector.load %arg4[%c0_6, %c0_7] : memref<8x128xf32, #tpu.memory_space<vmem>>, vector<8x128xf32>
    %11 = vector.shape_cast %9 : vector<8x128xf32> to vector<1x8x128xf32>
    %cst = arith.constant dense<0.000000e+00> : vector<8x128xf32>
    %12 = vector.multi_reduction <add>, %11, %cst [0] : vector<1x8x128xf32> to vector<8x128xf32>
    %13 = arith.addf %10, %12 : vector<8x128xf32>
    %c0_8 = arith.constant 0 : index
    %c0_9 = arith.constant 0 : index
    %14 = vector.load %arg4[%c0_8, %c0_9] : memref<8x128xf32, #tpu.memory_space<vmem>>, vector<8x128xf32>
    tpu.vector_store %arg4[%c0_8, %c0_9], %13 {strides = array<i32>} : memref<8x128xf32, #tpu.memory_space<vmem>>, vector<8x128xf32>,
    return
  }
  func.func @transform_0(%arg0: i32, %arg1: i32) -> (i32, i32, i32) {
    %c0_i32 = arith.constant 0 : i32
    %c0_i32_0 = arith.constant 0 : i32
    return %arg0, %arg1, %c0_i32 : i32, i32, i32
  }
  func.func @transform_1(%arg0: i32, %arg1: i32) -> (i32, i32, i32) {
    %c0_i32 = arith.constant 0 : i32
    %c0_i32_0 = arith.constant 0 : i32
    return %arg0, %arg1, %c0_i32 : i32, i32, i32
  }
  func.func @transform_2(%arg0: i32, %arg1: i32) -> (i32, i32) {
    %c0_i32 = arith.constant 0 : i32
    %c0_i32_0 = arith.constant 0 : i32
    return %arg0, %c0_i32 : i32, i32
  }
}

</mosaic_0001>

<bundles_post_ra>
// kernel: tpu_custom_call.1
= control target key start
LH: loop header
LB: loop body
LE: loop exit
PB: predicated region body
PF: predicated region fallthrough
CT: control target
= control target key end

     0   :  { %7 = vsyncpa [#allocation3], 0  ;;  %s726_s0 = inlined_call_operand.hbm [shape: f32[2,8,128], index: 0, kind: input, shape index: {}]   ;;  %s727_s1 = inlined_call_operand.hbm [shape: f32[2,8,128], index: 1, kind: input, shape index: {}]   ;;  %s728_s2 = inlined_call_operand.hbm [shape: f32[16,128], index: 2, kind: output, shape index: {}]  }
   0x1   :  { %9 = vsyncpa [#allocation3 + $0x1], 0 }
   0x2   :  { %10 = vsyncpa [#allocation6], 0 }
   0x3   :  { %12 = vsyncpa [#allocation6 + $0x1], 0 }
   0x4   :  { %13 = vsyncpa [#allocation4], 0 }
   0x5   :  { %15 = vsyncpa [#allocation4 + $0x1], 0  ;;  %s598_s9 = smov 0   ;;  %s600_s10 = smov 0  }
   0x6   :  { %s602_s11 = smov 0   ;;  %s604_s12 = smov 0  }
   0x7   :  { %s606_s13 = smov 0   ;;  %s608_s14 = smov 0  }
   0x8 LB: > { %s351_s15 = sadd.s32 4294967295, %s581_s14   ;;  %s352_s16 = sadd.s32 4294967294, %s581_s14   ;;  %s581_s14 = sphi %s608_s14, %s21_s14   ;;  %s577_s13 = sphi %s606_s13, %s737_s13   ;;  %s573_s12 = sphi %s604_s12, %s736_s12   ;;  %s569_s11 = sphi %s602_s11, %s735_s11   ;;  %s565_s10 = sphi %s600_s10, %s734_s10   ;;  %s561_s9 = sphi %s598_s9, %s733_s9  }
   0x9   : > { %s33_s17 = sadd.s32 1, %s577_s13  ;;  %s42_s18 = sadd.s32 1, %s569_s11 }
   0xa   : > { %p35_p0 = scmp.ge.s32.totalorder %s33_s17, 2  ;;  %p49_p1 = scmp.ne.s32.totalorder %s569_s11, %s565_s10 }
   0xb   : > { %p50_p2 = scmp.eq.s32.totalorder %s581_s14, 0  ;;  %p55_p3 = scmp.ne.s32.totalorder %s565_s10, %s561_s9 }
   0xc   : > { %s739_s17 = smov (%p35_p0, %s33_s17), 0  ;;  %p56_p5 = scmp.eq.s32.totalorder %s351_s15, 0 }
   0xd   : > { %p639_p4 = por %p50_p2, %p49_p1  ;;  %s37_s20 = ssub.s32 %s577_s13, %s739_s17 }
   0xe   : > { %p107_p6 = scmp.eq.s32.totalorder %s351_s15, 1  ;;  %p40_p7 = scmp.eq.s32.totalorder %s37_s20, 0 }
   0xf   : > { %p645_p8 = por %p56_p5, %p55_p3  ;;  %p113_p10 = scmp.eq.s32.totalorder %s352_s16, 1 }
  0x10   : > { %p649_p9 = por %p107_p6, %p49_p1  ;;  %p354_p12 = scmp.ge.s32.totalorder %s581_s14, 2 }
  0x11   : > { %s654_s23 = scalar_select %p40_p7, %s569_s11, %s42_s18  }
  0x12   : > { %p656_p11 = por %p113_p10, %p55_p3  ;;  %p384_p13 = scmp.lt.s32.totalorder %s581_s14, 2 }
  0x13   : > { %s133_s25 = sand.u32 1, %s569_s11   ;;  %s356_s27 = sshll.u32 %s577_s13, 3 }
  0x14   : > { %s355_s26 = sshll.u32 %s133_s25, 3  ;;  %s142_s30 = scalar_lea.hbm %s726_s0, %s356_s27 }
  0x15   : > { %s137_s3 = scalar_lea.vmem [#allocation2], %s355_s26  ;;  %s144_s5 = sshll.u32 %s142_s30, 4  ;;  %s145_s5 = int_to_ptr.hbm [resolvable:$true] %s144_s5 }
  0x16   : > { %s146_s4 = sshll.u32 %s137_s3, 4  ;;  %p374_p0 = pnand %p384_p13, %p639_p4  ;;  %s147_s4 = int_to_ptr.vmem [resolvable:$true] %s146_s4 }
  0x17   : > { %p359_p1 = scmp.ge.s32.totalorder %s581_s14, 1  ;;  %p171_p2 = scmp.lt.s32.totalorder %s581_s14, 3 }
  0x18   : > { %s134_s6 = scalar_lea.sflag [#allocation3], %s133_s25  ;;  %s162_s15 = scalar_lea.hbm %s727_s1, %s356_s27 }
  0x19   : > { %376 = dma.hbm_to_vmem [thread:$0]  (!%p374_p0), %s145_s5, 128, %s147_s4, %s134_s6  }
  0x1a   : > { %p172_p3 = pnand %p359_p1, %p171_p2  ;;  %s157_s16 = scalar_lea.vmem [#allocation5], %s355_s26 }
  0x1b   : > { %s166_s18 = sshll.u32 %s157_s16, 4  ;;  %s164_s20 = sshll.u32 %s162_s15, 4  ;;  %s167_s18 = int_to_ptr.vmem [resolvable:$true] %s166_s18  ;;  %s165_s20 = int_to_ptr.hbm [resolvable:$true] %s164_s20 }
  0x1c   : > { %s154_s28 = scalar_lea.sflag [#allocation6], %s133_s25  ;;  %175 = sbr.rel (%p172_p3) target bundleno = 51 (0x33), region = 28 }
  0x1d   : > { %379 = dma.hbm_to_vmem [thread:$0]  (!%p374_p0), %s165_s20, 128, %s167_s18, %s154_s28  }
  0x1e   : > { %s675_s19 = sand.u32 (!%p172_p3), 1, %s565_s10  }
  0x1f   : > { %s360_s29 = sshll.u32 (!%p172_p3), %s675_s19, 3  ;;  %s178_s30 = scalar_lea.sflag (!%p172_p3), [#allocation3], %s675_s19 }
  0x20   : > { %s181_s3 = scalar_lea.vmem (!%p172_p3), [#allocation2], %s360_s29 }
  0x21   : > { %548 = dma.done.wait (%p645_p8), %s178_s30, 128  }
  0x22   : > { %550 = vsyncadd (%p645_p8), %s178_s30, 4294967168  ;;  %s188_s26 = scalar_lea.sflag [#allocation6], %s675_s19  ;;  %s191_s25 = scalar_lea.vmem [#allocation5], %s360_s29 }
  0x23   : > { %552 = dma.done.wait (%p645_p8), %s188_s26, 128  }
  0x24   : > { %554 = vsyncadd (%p645_p8), %s188_s26, 4294967168  ;;  %s364_s27 = sshll.u32 %s573_s12, 3  ;;  %v223_v0 = vld [vmem:[%s181_s3] sm:$0xff]  ;;  %v224_v1 = vld [vmem:[%s191_s25] sm:$0xff]  ;;  %s217_s7 = scalar_lea.vmem [#allocation7], %s360_s29 }
  0x25   : > { %v225_v2 = vsub.f32 %v223_v0, %v224_v1  ;;  %s243_s6 = scalar_lea.hbm %s728_s2, %s364_s27  ;;  %s245_s8 = sshll.u32 %s217_s7, 4  ;;  %s246_s8 = int_to_ptr.vmem [resolvable:$true] %s245_s8 }
  0x26   : > { %s247_s15 = sshll.u32 %s243_s6, 4  ;;  %s233_s21 = scalar_lea.sflag [#allocation4], %s675_s19  ;;  %s248_s15 = int_to_ptr.hbm [resolvable:$true] %s247_s15 }
  0x27   : > { %v226_v3 = vmul.f32 %v225_v2, %v224_v1  ;;  %s509_s16 = sshra.s32 %s248_s15, 4  ;;  %s515_s28 = scalar_lea.hbm %s728_s2, 16  ;;  %s510_s16 = int_to_ptr.hbm [resolvable:$true] %s509_s16 }
  0x28   : > { %s511_s12 = scalar_lea.hbm %s510_s16, 8  ;;  %p516_p7 = scmp.lt.s32.totalorder %s510_s16, %s728_s2 }
  0x29   : > { %v227_v4 = vmul.f32 %v226_v3, %v226_v3  ;;  %p512_p4 = scmp.ne.s32.totalorder %s510_s16, %s511_s12  ;;  %p517_p8 = scmp.lt.s32.totalorder %s515_s28, %s511_s12 }
  0x2b   : > { %231 = vst [vmem:[%s217_s7] sm:$0xff] %v227_v4  ;;  %p513_p5 = pnand %p512_p4, %p649_p9  ;;  %p518_p10 = por %p517_p8, %p516_p7 }
  0x2d   : > { %p514_p6 = pneg %p513_p5 }
  0x2f   : > { %p519_p13 = pnand %p518_p10, %p514_p6 }
  0x31   : > { %522 = shalt.err (!%p519_p13)
}
  0x32   : > { %371 = dma.vmem_to_hbm [thread:$0]  (%p649_p9), %s246_s8, 128, %s248_s15, %s233_s21  }
  0x33 PF: > { %s259_s19 = sand.u32 1, %s561_s9   ;;  %p381_p0 = pnand %p354_p12, %p656_p11 }
  0x34   : > { %s260_s3 = scalar_lea.sflag [#allocation4], %s259_s19 }
  0x35   : > { %p382_p1 = pneg %p381_p0 }
  0x37   : > { %556 = dma.done.wait (%p382_p1), %s260_s3, 128  }
  0x38   : > { %558 = vsyncadd (%p382_p1), %s260_s3, 4294967168  ;;  %s21_s14 = sadd.s32 1, %s581_s14   ;;  %s733_s9 = smov %s565_s10 }
  0x39   : > { %p18_p2 = scmp.ge.s32.totalorder %s21_s14, 4   ;;  %s734_s10 = smov %s569_s11 }
  0x3a   : > { %s735_s11 = smov %s654_s23  ;;  %s736_s12 = smov %s577_s13 }
  0x3b   : > { %s737_s13 = smov %s739_s17  ;;  %20 = sbr.rel (!%p18_p2) target bundleno = 8 (0x8), region = 90 }
  0x40   :  { %266 = vsyncpa [#allocation3], 1 }
  0x41   :  { %268 = vsyncpa [#allocation3 + $0x1], 1 }
  0x42   :  { %269 = vsyncpa [#allocation6], 1 }
  0x43   :  { %271 = vsyncpa [#allocation6 + $0x1], 1 }
  0x44   :  { %272 = vsyncpa [#allocation4], 1 }
  0x45   :  { %274 = vsyncpa [#allocation4 + $0x1], 1 }

</bundles_post_ra>
